<compile_context>
chip_gen: v6e
topology: v6e:2x2x1
jax: 0.10.0
libtpu: 0.0.40
codegen_flags: <defaults>
</compile_context>

<pallas_src>
import numpy as np
import jax
import jax.numpy as jnp
from jax.experimental import pallas as pl
from jax.experimental.pallas import tpu as pltpu


# ----------------------------------------------------------------------------
# Synthetic geometry (stands in for the CaloChallenge `bins` object)
# ----------------------------------------------------------------------------
LAY_R_EDGES = [
    [0.0, 1.0, 2.0, 4.0],            # layer 0: 3 radial bins
    [0.0, 2.0, 4.0],                 # layer 1: 2 radial bins
    [0.0, 1.0, 2.0, 3.0, 4.0],       # layer 2: 4 radial bins
]
ALPHA_OUT = 4
LAY_ALPHAS = [1, 4, 4]               # layer 0 has a single alpha bin
EPS = 1e-5

LANE = 128
SUBLANE = 8
SMALL_BATCH_FALLBACK = 512           # below this, XLA dot beats pallas_call launch cost
MAX_TILE_M_DEFAULT = 8192            # batch-tile cap (multiple of 8), review item 1


def _round_up(x, m):
    return ((x + m - 1) // m) * m


def build_geometry():
    """Replicates GeomConverter.__init__ weight-matrix construction in numpy."""
    all_r_edges = np.unique(
        np.concatenate([np.asarray(e, np.float32) for e in LAY_R_EDGES])
    ).astype(np.float32)
    all_r_areas = all_r_edges[1:] ** 2 - all_r_edges[:-1] ** 2
    dim_r_out = len(all_r_edges) - 1

    weight_mats = []
    for edges in LAY_R_EDGES:
        edges = np.asarray(edges, np.float32)
        dim_in = len(edges) - 1
        wm = np.zeros((dim_r_out, dim_in), np.float32)
        for ir in range(dim_in):
            s = int(np.nonzero(all_r_edges == edges[ir])[0][0])
            t = int(np.nonzero(all_r_edges == edges[ir + 1])[0][0])
            orig_area = edges[ir + 1] ** 2 - edges[ir] ** 2
            wm[s:t, ir] = all_r_areas[s:t] / orig_area
        weight_mats.append(wm)

    counts = [LAY_ALPHAS[i] * (len(LAY_R_EDGES[i]) - 1) for i in range(len(LAY_R_EDGES))]
    layer_boundaries = np.concatenate([[0], np.cumsum(counts)]).astype(np.int64)
    return weight_mats, dim_r_out, layer_boundaries


def init_enc_weights(weight_mats, key):
    """NNConverter.__init__: enc weight = geometric weight + eps * randn."""
    enc_ws = []
    for wm in weight_mats:
        key, sub = jax.random.split(key)
        noise = jax.random.normal(sub, wm.shape, dtype=jnp.float32)
        enc_ws.append(jnp.asarray(wm) + EPS * noise)
    # TODO(synk): decoder (dec) weights pinv(W)+eps*noise exist in __init__ but are
    # unused by forward() (forward == enc); not materialized here.
    return enc_ws


# ----------------------------------------------------------------------------
# One-time weight-side prep: block-diagonal fused weight (hoisted out of forward)
# ----------------------------------------------------------------------------
def build_big_weight(enc_ws, layer_boundaries, dim_r_out):
    """W_big: (total_voxels, d_out) with d_out = L*ALPHA_OUT*dim_r_out.
       out_flat[b, i*A*D + a*D + d] = sum_r W_i[d, r] * x[b, lb0_i + a_in*r_i + r]
       (alpha==1 layer replicated into all output alpha bins, pre-scaled 1/A)."""
    L = len(enc_ws)
    D = dim_r_out
    total_voxels = int(layer_boundaries[-1])
    d_out = L * ALPHA_OUT * D

    w_big = np.zeros((total_voxels, d_out), np.float32)
    for i in range(L):
        lb0 = int(layer_boundaries[i])
        r_i = len(LAY_R_EDGES[i]) - 1
        wi = np.asarray(enc_ws[i], np.float32)          # (D, r_i)
        if LAY_ALPHAS[i] == 1:
            w_scaled = wi / ALPHA_OUT                   # divide-before-dot (see header)
            for a in range(ALPHA_OUT):
                col0 = i * ALPHA_OUT * D + a * D
                w_big[lb0:lb0 + r_i, col0:col0 + D] = w_scaled.T
        else:
            for a in range(ALPHA_OUT):
                row0 = lb0 + a * r_i
                col0 = i * ALPHA_OUT * D + a * D
                w_big[row0:row0 + r_i, col0:col0 + D] = wi.T
    return jnp.asarray(w_big), d_out


# ----------------------------------------------------------------------------
# Pallas kernel: single fused matmul, tiled over batch only
# ----------------------------------------------------------------------------
def _enc_kernel(x_ref, w_ref, o_ref):
    # x_ref: (tile_m, K)   w_ref: (K, d_out)   o_ref: (tile_m, d_out)
    o_ref[...] = jnp.dot(
        x_ref[...], w_ref[...], preferred_element_type=jnp.float32
    ).astype(o_ref.dtype)


def enc_matmul_pallas(x, w_big, tile_m):
    """x: (n, K) f32, w_big: (K, d_out) f32 -> (n, d_out) f32.  Ragged last block OK."""
    n, K = x.shape
    d_out = w_big.shape[1]
    grid = (pl.cdiv(n, tile_m),)

    # Double-buffered VMEM footprint (lane dim pads to 128 in VMEM layout) + headroom.
    x_buf = tile_m * _round_up(K, LANE) * 4
    o_buf = tile_m * _round_up(d_out, LANE) * 4
    w_buf = _round_up(K, SUBLANE) * _round_up(d_out, LANE) * 4
    vmem_limit = 2 * (x_buf + o_buf + w_buf) + (4 << 20)

    return pl.pallas_call(
        _enc_kernel,
        out_shape=jax.ShapeDtypeStruct((n, d_out), jnp.float32),
        grid_spec=pltpu.PrefetchScalarGridSpec(
            num_scalar_prefetch=0,
            grid=grid,
            in_specs=[
                pl.BlockSpec((tile_m, K), lambda i: (i, 0)),    # batch tile of x
                pl.BlockSpec((K, d_out), lambda i: (0, 0)),     # resident tiny weight
            ],
            out_specs=pl.BlockSpec((tile_m, d_out), lambda i: (i, 0)),
        ),
        compiler_params=pltpu.CompilerParams(
            dimension_semantics=("parallel",),     # independent batch tiles (2 TCs on v7x)
            vmem_limit_bytes=int(vmem_limit),      # computed, not guessed (v5e 16 MiB default)
        ),
    )(x, w_big)


# ----------------------------------------------------------------------------
# NNConverter.forward (== enc) wrapper
# ----------------------------------------------------------------------------
def nnconverter_forward(x, w_big, num_layers, dim_r_out, max_tile_m=MAX_TILE_M_DEFAULT):
    """x: (batch, total_voxels) f32 -> (batch, 1, num_layers, ALPHA_OUT, dim_r_out)."""
    n = x.shape[0]
    x = x.astype(jnp.float32)

    if n < SMALL_BATCH_FALLBACK:
        # Small-batch fallback: pallas_call launch/pipeline overhead dominates here.
        o = jnp.dot(x, w_big, preferred_element_type=jnp.float32)
    else:
        # >=2 grid steps (so v7x's two TensorCores both get work); multiple of 8;
        # capped so the double-buffered footprint stays comfortably in VMEM.
        tile_m = min(max_tile_m, _round_up(pl.cdiv(n, 2), SUBLANE))
        o = enc_matmul_pallas(x, w_big, tile_m)

    # (n, d_out) is already contiguous in the target order -> free reshape, no HBM pass.
    return o.reshape(n, 1, num_layers, ALPHA_OUT, dim_r_out)


# ----------------------------------------------------------------------------
if __name__ == "__main__":
    weight_mats, dim_r_out, layer_boundaries = build_geometry()

    key = jax.random.PRNGKey(0)
    key, wkey = jax.random.split(key)
    enc_ws = init_enc_weights(weight_mats, wkey)

    # one-time fused-weight construction (init-time, not per forward)
    w_big, d_out = build_big_weight(enc_ws, layer_boundaries, dim_r_out)

    total_voxels = int(layer_boundaries[-1])                 # 27
    L = len(LAY_R_EDGES)

    def reference(x):
        """Pure-JAX reference of the original per-layer PyTorch semantics."""
        n = x.shape[0]
        outs = []
        for i in range(L):
            lb0, lb1 = int(layer_boundaries[i]), int(layer_boundaries[i + 1])
            r_i = len(LAY_R_EDGES[i]) - 1
            xi = x[:, lb0:lb1].reshape(n, LAY_ALPHAS[i], r_i)
            oi = jnp.einsum("ij,baj->bai", enc_ws[i], xi)
            if LAY_ALPHAS[i] == 1:
                oi = jnp.repeat(oi, ALPHA_OUT, axis=-2) / ALPHA_OUT
            outs.append(oi)
        return jnp.stack(outs, axis=1)[:, None]              # (n,1,L,A,D)

    # --- small-batch demo (module-consistent shape; takes the XLA fallback path) ---
    key, k1 = jax.random.split(key)
    x_small = jax.random.uniform(k1, (2, total_voxels), dtype=jnp.float32)
    out_small = jax.block_until_ready(nnconverter_forward(x_small, w_big, L, dim_r_out))
    assert out_small.shape == (2, 1, L, ALPHA_OUT, dim_r_out)
    np.testing.assert_allclose(np.asarray(out_small), np.asarray(reference(x_small)),
                               rtol=1e-5, atol=1e-5)

    # --- larger batch exercising the Pallas kernel (2 grid steps, ragged last block) ---
    key, k2 = jax.random.split(key)
    x_big = jax.random.uniform(k2, (1234, total_voxels), dtype=jnp.float32)
    out_big = jax.block_until_ready(nnconverter_forward(x_big, w_big, L, dim_r_out))
    assert out_big.shape == (1234, 1, L, ALPHA_OUT, dim_r_out)
    np.testing.assert_allclose(np.asarray(out_big), np.asarray(reference(x_big)),
                               rtol=1e-5, atol=1e-5)

    print("KERNEL_OK")
</pallas_src>

<mosaic_0001>
module attributes {stable_mosaic.version = 11 : i64} {
  func.func @_enc_kernel(%arg0: i32, %arg1: memref<624x27xf32, #tpu.memory_space<vmem>>, %arg2: memref<27x48xf32, #tpu.memory_space<vmem>>, %arg3: memref<624x48xf32, #tpu.memory_space<vmem>>) attributes {dimension_semantics = [#tpu.dimension_semantics<parallel>], iteration_bounds = array<i64: 2>, scalar_prefetch = 0 : i64, scratch_operands = 0 : i64, tpu.core_type = #tpu.core_type<tc>, window_params = [{transform_indices = @transform_0, window_bounds = array<i64: 624, 27>}, {pipeline_mode = #tpu.pipeline_mode<synchronous>, transform_indices = @transform_1, window_bounds = array<i64: 27, 48>}, {transform_indices = @transform_2, window_bounds = array<i64: 624, 48>}]} {
    %c0 = arith.constant 0 : index
    %c0_0 = arith.constant 0 : index
    %0 = vector.load %arg1[%c0, %c0_0] : memref<624x27xf32, #tpu.memory_space<vmem>>, vector<624x27xf32>
    %c0_1 = arith.constant 0 : index
    %c0_2 = arith.constant 0 : index
    %1 = vector.load %arg2[%c0_1, %c0_2] : memref<27x48xf32, #tpu.memory_space<vmem>>, vector<27x48xf32>
    %cst = arith.constant dense<0.000000e+00> : vector<624x48xf32>
    %2 = tpu.matmul %0, %1, %cst {dimension_numbers = #tpu.dot_dimension_numbers<[1], [0], [0], [1], [0, 0, 1, 1], [], []>} : vector<624x27xf32>, vector<27x48xf32>, vector<624x48xf32> -> vector<624x48xf32>
    %c0_3 = arith.constant 0 : index
    %c0_4 = arith.constant 0 : index
    %3 = vector.load %arg3[%c0_3, %c0_4] : memref<624x48xf32, #tpu.memory_space<vmem>>, vector<624x48xf32>
    tpu.vector_store %arg3[%c0_3, %c0_4], %2 {strides = array<i32>} : memref<624x48xf32, #tpu.memory_space<vmem>>, vector<624x48xf32>,
    return
  }
  func.func @transform_0(%arg0: i32) -> (i32, i32) {
    %c0_i32 = arith.constant 0 : i32
    %c0_i32_0 = arith.constant 0 : i32
    return %arg0, %c0_i32 : i32, i32
  }
  func.func @transform_1(%arg0: i32) -> (i32, i32) {
    %c0_i32 = arith.constant 0 : i32
    %c0_i32_0 = arith.constant 0 : i32
    %c0_i32_1 = arith.constant 0 : i32
    return %c0_i32, %c0_i32_0 : i32, i32
  }
  func.func @transform_2(%arg0: i32) -> (i32, i32) {
    %c0_i32 = arith.constant 0 : i32
    %c0_i32_0 = arith.constant 0 : i32
    return %arg0, %c0_i32 : i32, i32
  }
}

</mosaic_0001>

<bundles_post_ra>
// kernel: tpu_custom_call.1
= control target key start
LH: loop header
LB: loop body
LE: loop exit
PB: predicated region body
PF: predicated region fallthrough
CT: control target
= control target key end

     0   :  { %s1997_s9 = smov 0   ;;  %s1999_s10 = smov 0   ;;  %s2569_s0 = inlined_call_operand.vmem [shape: f32[1234,27], index: 0, kind: input, shape index: {}]   ;;  %s2570_s1 = inlined_call_operand.vmem [shape: f32[27,48], index: 1, kind: input, shape index: {}]   ;;  %s2571_s2 = inlined_call_operand.vmem [shape: f32[1234,48], index: 2, kind: output, shape index: {}]  }
   0x1   :  { %s2001_s11 = smov 0  }
   0x2 LB: > { %s2010_s12 = sadd.s32 4294967295, %s1948_s11   ;;  %s2012_s13 = sadd.s32 1, %s1948_s11   ;;  %s1948_s11 = sphi %s2001_s11, %s2580_s11   ;;  %s1944_s10 = sphi %s1999_s10, %s2579_s10   ;;  %s1940_s9 = sphi %s1997_s9, %s2578_s9  }
   0x3   : > { %s63_s14 = ssub.s32 %s1948_s11, %s2012_s13  ;;  %s66_s15 = sadd.s32 1, %s1944_s10 }
   0x4   : > { %p64_p0 = scmp.eq.s32.totalorder %s63_s14, 0  ;;  %p76_p1 = scmp.ne.s32.totalorder %s1944_s10, %s1940_s9 }
   0x5   : > { %p77_p2 = scmp.eq.s32.totalorder %s2010_s12, 1  ;;  %p1491_p3 = scmp.ge.s32.totalorder %s1948_s11, 1 }
   0x6   : > { %s2020_s16 = scalar_select %p64_p0, %s1944_s10, %s66_s15  }
   0x7   : > { %p2022_p4 = por %p77_p2, %p76_p1  ;;  %p121_p5 = scmp.lt.s32.totalorder %s1948_s11, 3 }
   0x9   : > { %p122_p6 = pnand %p1491_p3, %p121_p5 }
   0xa   : > { %s2033_s22 = smul.u32 (!%p122_p6), 78, %s2010_s12  ;;  %s143_s4 = sand.u32 (!%p122_p6), 1, %s1940_s9  }
   0xb   : > { %125 = sbr.rel (%p122_p6) target bundleno = 362 (0x16a), region = 28 }
   0xc   : > { %p151_p7 = scmp.lt.s32.totalorder (!%p122_p6), %s2033_s22, 154  ;;  %s1805_s5 = smul.u32 (!%p122_p6), 624, %s143_s4 }
   0xe   : > { %s2205_s6 = scalar_lea.vmem (!%p122_p6), [#allocation2], %s1805_s5  }
  0x10   : > { %v246_v0 = vld [vmem:[%s2570_s1 + $0x18] sm:$0x7]  ;;  %vm482_vm0 = vcmask 1042432   ;;  %v245_v1 = vld [vmem:[%s2570_s1 + $0x10] sm:$0xff]  ;;  %v244_v2 = vld [vmem:[%s2570_s1 + $0x8] sm:$0xff]  ;;  %s152_s27 = scalar_select %p151_p7, %s2033_s22, 154 }
  0x11   : > { %1672 = vmatprep.subr.msk.mxu0 %vm482_vm0, %v246_v0  ;;  %1797 = vmatprep.subr.msk.mxu1 %vm482_vm0, %v246_v0  ;;  %v243_v3 = vld [vmem:[%s2570_s1] sm:$0xff]  ;;  %vm247_vm1 = vcmask 220160   ;;  %vm941_vm2 = vcmask 392192   ;;  %s1028_s7 = ssub.s32 (%p2022_p4), 155, %s2033_s22  ;;  %s1587_s8 = smul.u32 (%p2022_p4), 624, %s2010_s12 }
  0x12   : > { %1673 = vmatpush3.msk.msra.mxu0 %vm482_vm0, %v246_v0  ;;  %1801 = vmatpush3.msk.msra.mxu1 %vm482_vm0, %v246_v0  ;;  %s1492_s28 = sshll.u32 %s152_s27, 3  ;;  %p1029_p8 = scmp.lt.s32.totalorder (%p2022_p4), %s1028_s7, 78 }
  0x13   : > { %1674 = vmatprep.subr.mxu0 %v245_v1  ;;  %1798 = vmatprep.subr.mxu1 %v245_v1  ;;  %s2046_s3 = scalar_lea.vmem %s2569_s0, %s1492_s28  ;;  %s2370_s14 = scalar_lea.vmem (%p2022_p4), %s2571_s2, %s1587_s8  }
  0x14   : > { %1675 = vmatpush3.msra.mxu0 %v245_v1  ;;  %1802 = vmatpush3.msra.mxu1 %v245_v1  ;;  %v165_v4 = vld [vmem:[%s2046_s3] sm:$0xff]  ;;  %v166_v5 = vld [vmem:[%s2046_s3 + $0x8] sm:$0xff]  ;;  %v167_v8 = vld [vmem:[%s2046_s3 + $0x10] sm:$0xff] }
  0x15   : > { %1676 = vmatprep.subr.mxu0 %v244_v2  ;;  %1799 = vmatprep.subr.mxu1 %v244_v2  ;;  %v205_v6 = vld [vmem:[%s2046_s3 + $0x140] sm:$0xff]  ;;  %v206_v7 = vld [vmem:[%s2046_s3 + $0x148] sm:$0xff]  ;;  %v207_v9 = vld [vmem:[%s2046_s3 + $0x150] sm:$0xff] }
  0x16   : > { %1677 = vmatpush3.msra.mxu0 %v244_v2  ;;  %1803 = vmatpush3.msra.mxu1 %v244_v2  ;;  %v168_v10 = vld [vmem:[%s2046_s3 + $0x18] sm:$0xff]  ;;  %v169_v12 = vld [vmem:[%s2046_s3 + $0x20] sm:$0xff]  ;;  %v170_v14 = vld [vmem:[%s2046_s3 + $0x28] sm:$0xff] }
  0x17   : > { %1678 = vmatprep.subr.mxu0 %v243_v3  ;;  %1800 = vmatprep.subr.mxu1 %v243_v3  ;;  %v208_v11 = vld [vmem:[%s2046_s3 + $0x158] sm:$0xff]  ;;  %v209_v13 = vld [vmem:[%s2046_s3 + $0x160] sm:$0xff]  ;;  %v210_v15 = vld [vmem:[%s2046_s3 + $0x168] sm:$0xff] }
  0x18   : > { %1679 = vmatpush3.msra.mxu0 %v243_v3  ;;  %1804 = vmatpush3.msra.mxu1 %v243_v3  ;;  %v171_v16 = vld [vmem:[%s2046_s3 + $0x30] sm:$0xff]  ;;  %v172_v18 = vld [vmem:[%s2046_s3 + $0x38] sm:$0xff]  ;;  %v173_v20 = vld [vmem:[%s2046_s3 + $0x40] sm:$0xff] }
  0x19   : > { %1680 = vmatprep.mubr.msk.f32.mxu0 %vm247_vm1, %v165_v4  ;;  %1740 = vmatprep.mubr.msk.f32.mxu1 %vm247_vm1, %v205_v6  ;;  %v211_v17 = vld [vmem:[%s2046_s3 + $0x170] sm:$0xff]  ;;  %v212_v19 = vld [vmem:[%s2046_s3 + $0x178] sm:$0xff]  ;;  %v213_v21 = vld [vmem:[%s2046_s3 + $0x180] sm:$0xff] }
  0x1a   : > { %1681 = vmatmul.mubr.msk.f32.vlgmr.msra.gmra.mxu0 %vm247_vm1, %v166_v5  ;;  %1741 = vmatmul.mubr.msk.f32.vlgmr.msra.gmra.mxu1 %vm247_vm1, %v206_v7  ;;  %v174_v22 = vld [vmem:[%s2046_s3 + $0x48] sm:$0xff]  ;;  %v175_v24 = vld [vmem:[%s2046_s3 + $0x50] sm:$0xff]  ;;  %v176_v26 = vld [vmem:[%s2046_s3 + $0x58] sm:$0xff] }
  0x1b   : > { %1683 = vmatprep.mubr.msk.f32.mxu0 %vm247_vm1, %v167_v8  ;;  %1743 = vmatprep.mubr.msk.f32.mxu1 %vm247_vm1, %v207_v9  ;;  %v214_v23 = vld [vmem:[%s2046_s3 + $0x188] sm:$0xff]  ;;  %v215_v25 = vld [vmem:[%s2046_s3 + $0x190] sm:$0xff]  ;;  %v216_v27 = vld [vmem:[%s2046_s3 + $0x198] sm:$0xff] }
  0x1c   : > { %v177_v28 = vld [vmem:[%s2046_s3 + $0x60] sm:$0xff]  ;;  %v178_v30 = vld [vmem:[%s2046_s3 + $0x68] sm:$0xff]  ;;  %v179_v32 = vld [vmem:[%s2046_s3 + $0x70] sm:$0xff] }
  0x1d   : > { %v217_v29 = vld [vmem:[%s2046_s3 + $0x1a0] sm:$0xff]  ;;  %v218_v31 = vld [vmem:[%s2046_s3 + $0x1a8] sm:$0xff]  ;;  %v219_v33 = vld [vmem:[%s2046_s3 + $0x1b0] sm:$0xff] }
  0x1e   : > { %1684 = vmatmul.mubr.msk.f32.gmra.mxu0 %vm247_vm1, %v168_v10  ;;  %1744 = vmatmul.mubr.msk.f32.gmra.mxu1 %vm247_vm1, %v208_v11  ;;  %v180_v34 = vld [vmem:[%s2046_s3 + $0x78] sm:$0xff]  ;;  %v181_v36 = vld [vmem:[%s2046_s3 + $0x80] sm:$0xff]  ;;  %v182_v38 = vld [vmem:[%s2046_s3 + $0x88] sm:$0xff] }
  0x1f   : > { %1686 = vmatprep.mubr.msk.f32.mxu0 %vm247_vm1, %v169_v12  ;;  %1746 = vmatprep.mubr.msk.f32.mxu1 %vm247_vm1, %v209_v13  ;;  %v220_v35 = vld [vmem:[%s2046_s3 + $0x1b8] sm:$0xff]  ;;  %v221_v37 = vld [vmem:[%s2046_s3 + $0x1c0] sm:$0xff]  ;;  %v222_v39 = vld [vmem:[%s2046_s3 + $0x1c8] sm:$0xff] }
  0x20   : > { %v183_v40 = vld [vmem:[%s2046_s3 + $0x90] sm:$0xff]  ;;  %v184_v42 = vld [vmem:[%s2046_s3 + $0x98] sm:$0xff]  ;;  %v185_v44 = vld [vmem:[%s2046_s3 + $0xa0] sm:$0xff] }
  0x21   : > { %v223_v41 = vld [vmem:[%s2046_s3 + $0x1d0] sm:$0xff]  ;;  %v224_v43 = vld [vmem:[%s2046_s3 + $0x1d8] sm:$0xff]  ;;  %v225_v45 = vld [vmem:[%s2046_s3 + $0x1e0] sm:$0xff] }
  0x22   : > { %1687 = vmatmul.mubr.msk.f32.gmra.mxu0 %vm247_vm1, %v170_v14  ;;  %1747 = vmatmul.mubr.msk.f32.gmra.mxu1 %vm247_vm1, %v210_v15  ;;  %v186_v46 = vld [vmem:[%s2046_s3 + $0xa8] sm:$0xff]  ;;  %v187_v48 = vld [vmem:[%s2046_s3 + $0xb0] sm:$0xff]  ;;  %v188_v50 = vld [vmem:[%s2046_s3 + $0xb8] sm:$0xff] }
  0x23   : > { %1689 = vmatprep.mubr.msk.f32.mxu0 %vm247_vm1, %v171_v16  ;;  %1749 = vmatprep.mubr.msk.f32.mxu1 %vm247_vm1, %v211_v17  ;;  %v226_v47 = vld [vmem:[%s2046_s3 + $0x1e8] sm:$0xff]  ;;  %v227_v49 = vld [vmem:[%s2046_s3 + $0x1f0] sm:$0xff]  ;;  %v228_v51 = vld [vmem:[%s2046_s3 + $0x1f8] sm:$0xff] }
  0x24   : > { %v189_v52 = vld [vmem:[%s2046_s3 + $0xc0] sm:$0xff]  ;;  %v190_v54 = vld [vmem:[%s2046_s3 + $0xc8] sm:$0xff]  ;;  %v191_v56 = vld [vmem:[%s2046_s3 + $0xd0] sm:$0xff] }
  0x25   : > { %v229_v53 = vld [vmem:[%s2046_s3 + $0x200] sm:$0xff]  ;;  %v230_v55 = vld [vmem:[%s2046_s3 + $0x208] sm:$0xff]  ;;  %v231_v57 = vld [vmem:[%s2046_s3 + $0x210] sm:$0xff] }
  0x26   : > { %1690 = vmatmul.mubr.msk.f32.gmra.mxu0 %vm247_vm1, %v172_v18  ;;  %1750 = vmatmul.mubr.msk.f32.gmra.mxu1 %vm247_vm1, %v212_v19  ;;  %v192_v58 = vld [vmem:[%s2046_s3 + $0xd8] sm:$0xff]  ;;  %v193_v60 = vld [vmem:[%s2046_s3 + $0xe0] sm:$0xff]  ;;  %v194_v62 = vld [vmem:[%s2046_s3 + $0xe8] sm:$0xff] }
  0x27   : > { %1692 = vmatprep.mubr.msk.f32.mxu0 %vm247_vm1, %v173_v20  ;;  %1752 = vmatprep.mubr.msk.f32.mxu1 %vm247_vm1, %v213_v21  ;;  %v232_v59 = vld [vmem:[%s2046_s3 + $0x218] sm:$0xff]  ;;  %v233_v61 = vld [vmem:[%s2046_s3 + $0x220] sm:$0xff]  ;;  %v234_v63 = vld [vmem:[%s2046_s3 + $0x228] sm:$0xff] }
  0x28   : > { %v195_v0 = vld [vmem:[%s2046_s3 + $0xf0] sm:$0xff]  ;;  %v196_v2 = vld [vmem:[%s2046_s3 + $0xf8] sm:$0xff]  ;;  %v197_v4 = vld [vmem:[%s2046_s3 + $0x100] sm:$0xff] }
  0x29   : > { %v235_v1 = vld [vmem:[%s2046_s3 + $0x230] sm:$0xff]  ;;  %v236_v3 = vld [vmem:[%s2046_s3 + $0x238] sm:$0xff]  ;;  %v237_v5 = vld [vmem:[%s2046_s3 + $0x240] sm:$0xff] }
  0x2a   : > { %1693 = vmatmul.mubr.msk.f32.gmra.mxu0 %vm247_vm1, %v174_v22  ;;  %1753 = vmatmul.mubr.msk.f32.gmra.mxu1 %vm247_vm1, %v214_v23  ;;  %v198_v6 = vld [vmem:[%s2046_s3 + $0x108] sm:$0xff]  ;;  %v199_v8 = vld [vmem:[%s2046_s3 + $0x110] sm:$0xff]  ;;  %v200_v10 = vld [vmem:[%s2046_s3 + $0x118] sm:$0xff] }
  0x2b   : > { %1695 = vmatprep.mubr.msk.f32.mxu0 %vm247_vm1, %v175_v24  ;;  %1755 = vmatprep.mubr.msk.f32.mxu1 %vm247_vm1, %v215_v25  ;;  %v238_v7 = vld [vmem:[%s2046_s3 + $0x248] sm:$0xff]  ;;  %v239_v9 = vld [vmem:[%s2046_s3 + $0x250] sm:$0xff]  ;;  %v240_v11 = vld [vmem:[%s2046_s3 + $0x258] sm:$0xff] }
  0x2c   : > { %v201_v12 = vld [vmem:[%s2046_s3 + $0x120] sm:$0xff]  ;;  %v202_v14 = vld [vmem:[%s2046_s3 + $0x128] sm:$0xff]  ;;  %v203_v16 = vld [vmem:[%s2046_s3 + $0x130] sm:$0xff] }
  0x2d   : > { %v241_v13 = vld [vmem:[%s2046_s3 + $0x260] sm:$0xff]  ;;  %v242_v15 = vld [vmem:[%s2046_s3 + $0x268] sm:$0xff]  ;;  %v204_v17 = vld [vmem:[%s2046_s3 + $0x138] sm:$0xff] }
  0x2e   : > { %1696 = vmatmul.mubr.msk.f32.gmra.mxu0 %vm247_vm1, %v176_v26  ;;  %1756 = vmatmul.mubr.msk.f32.gmra.mxu1 %vm247_vm1, %v216_v27 }
  0x2f   : > { %1698 = vmatprep.mubr.msk.f32.mxu0 %vm247_vm1, %v177_v28  ;;  %1758 = vmatprep.mubr.msk.f32.mxu1 %vm247_vm1, %v217_v29 }
  0x32   : > { %1699 = vmatmul.mubr.msk.f32.gmra.mxu0 %vm247_vm1, %v178_v30  ;;  %1759 = vmatmul.mubr.msk.f32.gmra.mxu1 %vm247_vm1, %v218_v31 }
  0x33   : > { %1701 = vmatprep.mubr.msk.f32.mxu0 %vm247_vm1, %v179_v32  ;;  %1761 = vmatprep.mubr.msk.f32.mxu1 %vm247_vm1, %v219_v33 }
  0x36   : > { %1702 = vmatmul.mubr.msk.f32.gmra.mxu0 %vm247_vm1, %v180_v34  ;;  %1762 = vmatmul.mubr.msk.f32.gmra.mxu1 %vm247_vm1, %v220_v35 }
  0x37   : > { %1704 = vmatprep.mubr.msk.f32.mxu0 %vm247_vm1, %v181_v36  ;;  %1764 = vmatprep.mubr.msk.f32.mxu1 %vm247_vm1, %v221_v37 }
  0x3a   : > { %1705 = vmatmul.mubr.msk.f32.gmra.mxu0 %vm247_vm1, %v182_v38  ;;  %1765 = vmatmul.mubr.msk.f32.gmra.mxu1 %vm247_vm1, %v222_v39 }
  0x3b   : > { %1707 = vmatprep.mubr.msk.f32.mxu0 %vm247_vm1, %v183_v40  ;;  %1767 = vmatprep.mubr.msk.f32.mxu1 %vm247_vm1, %v223_v41 }
  0x3e   : > { %1708 = vmatmul.mubr.msk.f32.gmra.mxu0 %vm247_vm1, %v184_v42  ;;  %1768 = vmatmul.mubr.msk.f32.gmra.mxu1 %vm247_vm1, %v224_v43 }
  0x3f   : > { %1710 = vmatprep.mubr.msk.f32.mxu0 %vm247_vm1, %v185_v44  ;;  %1770 = vmatprep.mubr.msk.f32.mxu1 %vm247_vm1, %v225_v45 }
  0x42   : > { %1711 = vmatmul.mubr.msk.f32.gmra.mxu0 %vm247_vm1, %v186_v46  ;;  %1771 = vmatmul.mubr.msk.f32.gmra.mxu1 %vm247_vm1, %v226_v47 }
  0x43   : > { %1713 = vmatprep.mubr.msk.f32.mxu0 %vm247_vm1, %v187_v48  ;;  %1773 = vmatprep.mubr.msk.f32.mxu1 %vm247_vm1, %v227_v49 }
  0x46   : > { %1714 = vmatmul.mubr.msk.f32.gmra.mxu0 %vm247_vm1, %v188_v50  ;;  %1774 = vmatmul.mubr.msk.f32.gmra.mxu1 %vm247_vm1, %v228_v51 }
  0x47   : > { %1716 = vmatprep.mubr.msk.f32.mxu0 %vm247_vm1, %v189_v52  ;;  %1776 = vmatprep.mubr.msk.f32.mxu1 %vm247_vm1, %v229_v53 }
  0x4a   : > { %1717 = vmatmul.mubr.msk.f32.gmra.mxu0 %vm247_vm1, %v190_v54  ;;  %1777 = vmatmul.mubr.msk.f32.gmra.mxu1 %vm247_vm1, %v230_v55 }
  0x4b   : > { %1719 = vmatprep.mubr.msk.f32.mxu0 %vm247_vm1, %v191_v56  ;;  %1779 = vmatprep.mubr.msk.f32.mxu1 %vm247_vm1, %v231_v57 }
  0x4e   : > { %1720 = vmatmul.mubr.msk.f32.gmra.mxu0 %vm247_vm1, %v192_v58  ;;  %1780 = vmatmul.mubr.msk.f32.gmra.mxu1 %vm247_vm1, %v232_v59 }
  0x4f   : > { %1722 = vmatprep.mubr.msk.f32.mxu0 %vm247_vm1, %v193_v60  ;;  %1782 = vmatprep.mubr.msk.f32.mxu1 %vm247_vm1, %v233_v61 }
  0x52   : > { %1723 = vmatmul.mubr.msk.f32.gmra.mxu0 %vm247_vm1, %v194_v62  ;;  %1783 = vmatmul.mubr.msk.f32.gmra.mxu1 %vm247_vm1, %v234_v63 }
  0x53   : > { %1725 = vmatprep.mubr.msk.f32.mxu0 %vm247_vm1, %v195_v0  ;;  %1785 = vmatprep.mubr.msk.f32.mxu1 %vm247_vm1, %v235_v1 }
  0x56   : > { %1726 = vmatmul.mubr.msk.f32.gmra.mxu0 %vm247_vm1, %v196_v2  ;;  %1786 = vmatmul.mubr.msk.f32.gmra.mxu1 %vm247_vm1, %v236_v3 }
  0x57   : > { %1728 = vmatprep.mubr.msk.f32.mxu0 %vm247_vm1, %v197_v4  ;;  %1788 = vmatprep.mubr.msk.f32.mxu1 %vm247_vm1, %v237_v5 }
  0x5a   : > { %1729 = vmatmul.mubr.msk.f32.gmra.mxu0 %vm247_vm1, %v198_v6  ;;  %1789 = vmatmul.mubr.msk.f32.gmra.mxu1 %vm247_vm1, %v238_v7 }
  0x5b   : > { %1731 = vmatprep.mubr.msk.f32.mxu0 %vm247_vm1, %v199_v8  ;;  %1791 = vmatprep.mubr.msk.f32.mxu1 %vm247_vm1, %v239_v9 }
  0x5e   : > { %1732 = vmatmul.mubr.msk.f32.gmra.mxu0 %vm247_vm1, %v200_v10  ;;  %1792 = vmatmul.mubr.msk.f32.gmra.mxu1 %vm247_vm1, %v240_v11 }
  0x5f   : > { %1734 = vmatprep.mubr.msk.f32.mxu0 %vm247_vm1, %v201_v12  ;;  %1794 = vmatprep.mubr.msk.f32.mxu1 %vm247_vm1, %v241_v13 }
  0x62   : > { %1735 = vmatmul.mubr.msk.f32.gmra.mxu0 %vm247_vm1, %v202_v14  ;;  %1795 = vmatmul.mubr.msk.f32.gmra.mxu1 %vm247_vm1, %v242_v15 }
  0x63   : > { %1737 = vmatprep.mubr.msk.f32.mxu0 %vm247_vm1, %v203_v16 }
  0x66   : > { %1738 = vmatmul.mubr.msk.f32.gmra.mxu0 %vm247_vm1, %v204_v17 }
  0xda   : > { %v1682_v18 = vpop.f32.mrf.mxu0  ;;  %v1742_v19 = vpop.f32.mrf.mxu1 }
  0xdb   : > { %943 = vst.msk [vmem:[%s2205_s6 + $0x8] sm:$0xff] %vm941_vm2, %v1682_v18  ;;  %983 = vst.msk [vmem:[%s2205_s6 + $0x148] sm:$0xff] %vm941_vm2, %v1742_v19 }
  0xdc   : > { %v552_v20 = vpop.f32.mrf.mxu0  ;;  %v752_v21 = vpop.f32.mrf.mxu1 }
  0xdd   : > { %942 = vst.msk [vmem:[%s2205_s6] sm:$0xff] %vm941_vm2, %v552_v20  ;;  %982 = vst.msk [vmem:[%s2205_s6 + $0x140] sm:$0xff] %vm941_vm2, %v752_v21 }
  0xde   : > { %v1685_v22 = vpop.f32.mrf.mxu0  ;;  %v1745_v23 = vpop.f32.mrf.mxu1 }
  0xdf   : > { %945 = vst.msk [vmem:[%s2205_s6 + $0x18] sm:$0xff] %vm941_vm2, %v1685_v22  ;;  %985 = vst.msk [vmem:[%s2205_s6 + $0x158] sm:$0xff] %vm941_vm2, %v1745_v23 }
  0xe0   : > { %v562_v24 = vpop.f32.mrf.mxu0  ;;  %v762_v25 = vpop.f32.mrf.mxu1 }
  0xe1   : > { %944 = vst.msk [vmem:[%s2205_s6 + $0x10] sm:$0xff] %vm941_vm2, %v562_v24  ;;  %984 = vst.msk [vmem:[%s2205_s6 + $0x150] sm:$0xff] %vm941_vm2, %v762_v25 }
  0xe2   : > { %v1688_v26 = vpop.f32.mrf.mxu0  ;;  %v1748_v27 = vpop.f32.mrf.mxu1 }
  0xe3   : > { %947 = vst.msk [vmem:[%s2205_s6 + $0x28] sm:$0xff] %vm941_vm2, %v1688_v26  ;;  %987 = vst.msk [vmem:[%s2205_s6 + $0x168] sm:$0xff] %vm941_vm2, %v1748_v27 }
  0xe4   : > { %v572_v28 = vpop.f32.mrf.mxu0  ;;  %v772_v29 = vpop.f32.mrf.mxu1 }
  0xe5   : > { %946 = vst.msk [vmem:[%s2205_s6 + $0x20] sm:$0xff] %vm941_vm2, %v572_v28  ;;  %986 = vst.msk [vmem:[%s2205_s6 + $0x160] sm:$0xff] %vm941_vm2, %v772_v29 }
  0xe6   : > { %v1691_v30 = vpop.f32.mrf.mxu0  ;;  %v1751_v31 = vpop.f32.mrf.mxu1 }
  0xe7   : > { %949 = vst.msk [vmem:[%s2205_s6 + $0x38] sm:$0xff] %vm941_vm2, %v1691_v30  ;;  %989 = vst.msk [vmem:[%s2205_s6 + $0x178] sm:$0xff] %vm941_vm2, %v1751_v31 }
  0xe8   : > { %v582_v32 = vpop.f32.mrf.mxu0  ;;  %v782_v33 = vpop.f32.mrf.mxu1 }
  0xe9   : > { %948 = vst.msk [vmem:[%s2205_s6 + $0x30] sm:$0xff] %vm941_vm2, %v582_v32  ;;  %988 = vst.msk [vmem:[%s2205_s6 + $0x170] sm:$0xff] %vm941_vm2, %v782_v33 }
  0xea   : > { %v1694_v34 = vpop.f32.mrf.mxu0  ;;  %v1754_v35 = vpop.f32.mrf.mxu1 }
  0xeb   : > { %951 = vst.msk [vmem:[%s2205_s6 + $0x48] sm:$0xff] %vm941_vm2, %v1694_v34  ;;  %991 = vst.msk [vmem:[%s2205_s6 + $0x188] sm:$0xff] %vm941_vm2, %v1754_v35 }
  0xec   : > { %v592_v36 = vpop.f32.mrf.mxu0  ;;  %v792_v37 = vpop.f32.mrf.mxu1 }
  0xed   : > { %950 = vst.msk [vmem:[%s2205_s6 + $0x40] sm:$0xff] %vm941_vm2, %v592_v36  ;;  %990 = vst.msk [vmem:[%s2205_s6 + $0x180] sm:$0xff] %vm941_vm2, %v792_v37 }
  0xee   : > { %v1697_v38 = vpop.f32.mrf.mxu0  ;;  %v1757_v39 = vpop.f32.mrf.mxu1 }
  0xef   : > { %953 = vst.msk [vmem:[%s2205_s6 + $0x58] sm:$0xff] %vm941_vm2, %v1697_v38  ;;  %993 = vst.msk [vmem:[%s2205_s6 + $0x198] sm:$0xff] %vm941_vm2, %v1757_v39 }
  0xf0   : > { %v602_v40 = vpop.f32.mrf.mxu0  ;;  %v802_v41 = vpop.f32.mrf.mxu1 }
  0xf1   : > { %952 = vst.msk [vmem:[%s2205_s6 + $0x50] sm:$0xff] %vm941_vm2, %v602_v40  ;;  %992 = vst.msk [vmem:[%s2205_s6 + $0x190] sm:$0xff] %vm941_vm2, %v802_v41 }
  0xf2   : > { %v1700_v42 = vpop.f32.mrf.mxu0  ;;  %v1760_v43 = vpop.f32.mrf.mxu1 }
  0xf3   : > { %955 = vst.msk [vmem:[%s2205_s6 + $0x68] sm:$0xff] %vm941_vm2, %v1700_v42  ;;  %995 = vst.msk [vmem:[%s2205_s6 + $0x1a8] sm:$0xff] %vm941_vm2, %v1760_v43 }
  0xf4   : > { %v612_v44 = vpop.f32.mrf.mxu0  ;;  %v812_v45 = vpop.f32.mrf.mxu1 }
  0xf5   : > { %954 = vst.msk [vmem:[%s2205_s6 + $0x60] sm:$0xff] %vm941_vm2, %v612_v44  ;;  %994 = vst.msk [vmem:[%s2205_s6 + $0x1a0] sm:$0xff] %vm941_vm2, %v812_v45 }
  0xf6   : > { %v1703_v46 = vpop.f32.mrf.mxu0  ;;  %v1763_v47 = vpop.f32.mrf.mxu1 }
  0xf7   : > { %957 = vst.msk [vmem:[%s2205_s6 + $0x78] sm:$0xff] %vm941_vm2, %v1703_v46  ;;  %997 = vst.msk [vmem:[%s2205_s6 + $0x1b8] sm:$0xff] %vm941_vm2, %v1763_v47 }
  0xf8   : > { %v622_v48 = vpop.f32.mrf.mxu0  ;;  %v822_v49 = vpop.f32.mrf.mxu1 }
  0xf9   : > { %956 = vst.msk [vmem:[%s2205_s6 + $0x70] sm:$0xff] %vm941_vm2, %v622_v48  ;;  %996 = vst.msk [vmem:[%s2205_s6 + $0x1b0] sm:$0xff] %vm941_vm2, %v822_v49 }
  0xfa   : > { %v1706_v50 = vpop.f32.mrf.mxu0  ;;  %v1766_v51 = vpop.f32.mrf.mxu1 }
  0xfb   : > { %959 = vst.msk [vmem:[%s2205_s6 + $0x88] sm:$0xff] %vm941_vm2, %v1706_v50  ;;  %999 = vst.msk [vmem:[%s2205_s6 + $0x1c8] sm:$0xff] %vm941_vm2, %v1766_v51 }
  0xfc   : > { %v632_v52 = vpop.f32.mrf.mxu0  ;;  %v832_v53 = vpop.f32.mrf.mxu1 }
  0xfd   : > { %958 = vst.msk [vmem:[%s2205_s6 + $0x80] sm:$0xff] %vm941_vm2, %v632_v52  ;;  %998 = vst.msk [vmem:[%s2205_s6 + $0x1c0] sm:$0xff] %vm941_vm2, %v832_v53 }
  0xfe   : > { %v1709_v54 = vpop.f32.mrf.mxu0  ;;  %v1769_v55 = vpop.f32.mrf.mxu1 }
  0xff   : > { %961 = vst.msk [vmem:[%s2205_s6 + $0x98] sm:$0xff] %vm941_vm2, %v1709_v54  ;;  %1001 = vst.msk [vmem:[%s2205_s6 + $0x1d8] sm:$0xff] %vm941_vm2, %v1769_v55 }
 0x100   : > { %v642_v56 = vpop.f32.mrf.mxu0  ;;  %v842_v57 = vpop.f32.mrf.mxu1 }
 0x101   : > { %960 = vst.msk [vmem:[%s2205_s6 + $0x90] sm:$0xff] %vm941_vm2, %v642_v56  ;;  %1000 = vst.msk [vmem:[%s2205_s6 + $0x1d0] sm:$0xff] %vm941_vm2, %v842_v57 }
 0x102   : > { %v1712_v58 = vpop.f32.mrf.mxu0  ;;  %v1772_v59 = vpop.f32.mrf.mxu1 }
 0x103   : > { %963 = vst.msk [vmem:[%s2205_s6 + $0xa8] sm:$0xff] %vm941_vm2, %v1712_v58  ;;  %1003 = vst.msk [vmem:[%s2205_s6 + $0x1e8] sm:$0xff] %vm941_vm2, %v1772_v59 }
 0x104   : > { %v652_v60 = vpop.f32.mrf.mxu0  ;;  %v852_v61 = vpop.f32.mrf.mxu1 }
 0x105   : > { %962 = vst.msk [vmem:[%s2205_s6 + $0xa0] sm:$0xff] %vm941_vm2, %v652_v60  ;;  %1002 = vst.msk [vmem:[%s2205_s6 + $0x1e0] sm:$0xff] %vm941_vm2, %v852_v61 }
 0x106   : > { %v1715_v62 = vpop.f32.mrf.mxu0  ;;  %v1775_v63 = vpop.f32.mrf.mxu1 }
 0x107   : > { %965 = vst.msk [vmem:[%s2205_s6 + $0xb8] sm:$0xff] %vm941_vm2, %v1715_v62  ;;  %1005 = vst.msk [vmem:[%s2205_s6 + $0x1f8] sm:$0xff] %vm941_vm2, %v1775_v63 }
 0x108   : > { %v662_v0 = vpop.f32.mrf.mxu0  ;;  %v862_v1 = vpop.f32.mrf.mxu1 }
 0x109   : > { %964 = vst.msk [vmem:[%s2205_s6 + $0xb0] sm:$0xff] %vm941_vm2, %v662_v0  ;;  %1004 = vst.msk [vmem:[%s2205_s6 + $0x1f0] sm:$0xff] %vm941_vm2, %v862_v1 }
 0x10a   : > { %v1718_v2 = vpop.f32.mrf.mxu0  ;;  %v1778_v3 = vpop.f32.mrf.mxu1 }
 0x10b   : > { %967 = vst.msk [vmem:[%s2205_s6 + $0xc8] sm:$0xff] %vm941_vm2, %v1718_v2  ;;  %1007 = vst.msk [vmem:[%s2205_s6 + $0x208] sm:$0xff] %vm941_vm2, %v1778_v3 }
 0x10c   : > { %v672_v4 = vpop.f32.mrf.mxu0  ;;  %v872_v5 = vpop.f32.mrf.mxu1 }
 0x10d   : > { %966 = vst.msk [vmem:[%s2205_s6 + $0xc0] sm:$0xff] %vm941_vm2, %v672_v4  ;;  %1006 = vst.msk [vmem:[%s2205_s6 + $0x200] sm:$0xff] %vm941_vm2, %v872_v5 }
 0x10e   : > { %v1721_v6 = vpop.f32.mrf.mxu0  ;;  %v1781_v7 = vpop.f32.mrf.mxu1 }
 0x10f   : > { %969 = vst.msk [vmem:[%s2205_s6 + $0xd8] sm:$0xff] %vm941_vm2, %v1721_v6  ;;  %1009 = vst.msk [vmem:[%s2205_s6 + $0x218] sm:$0xff] %vm941_vm2, %v1781_v7 }
 0x110   : > { %v682_v8 = vpop.f32.mrf.mxu0  ;;  %v882_v9 = vpop.f32.mrf.mxu1 }
 0x111   : > { %968 = vst.msk [vmem:[%s2205_s6 + $0xd0] sm:$0xff] %vm941_vm2, %v682_v8  ;;  %1008 = vst.msk [vmem:[%s2205_s6 + $0x210] sm:$0xff] %vm941_vm2, %v882_v9 }
 0x112   : > { %v1724_v10 = vpop.f32.mrf.mxu0  ;;  %v1784_v11 = vpop.f32.mrf.mxu1 }
 0x113   : > { %971 = vst.msk [vmem:[%s2205_s6 + $0xe8] sm:$0xff] %vm941_vm2, %v1724_v10  ;;  %1011 = vst.msk [vmem:[%s2205_s6 + $0x228] sm:$0xff] %vm941_vm2, %v1784_v11 }
 0x114   : > { %v692_v12 = vpop.f32.mrf.mxu0  ;;  %v892_v13 = vpop.f32.mrf.mxu1 }
 0x115   : > { %970 = vst.msk [vmem:[%s2205_s6 + $0xe0] sm:$0xff] %vm941_vm2, %v692_v12  ;;  %1010 = vst.msk [vmem:[%s2205_s6 + $0x220] sm:$0xff] %vm941_vm2, %v892_v13 }
 0x116   : > { %v1727_v14 = vpop.f32.mrf.mxu0  ;;  %v1787_v15 = vpop.f32.mrf.mxu1 }
 0x117   : > { %973 = vst.msk [vmem:[%s2205_s6 + $0xf8] sm:$0xff] %vm941_vm2, %v1727_v14  ;;  %1013 = vst.msk [vmem:[%s2205_s6 + $0x238] sm:$0xff] %vm941_vm2, %v1787_v15 }
 0x118   : > { %v702_v16 = vpop.f32.mrf.mxu0  ;;  %v902_v17 = vpop.f32.mrf.mxu1 }
 0x119   : > { %972 = vst.msk [vmem:[%s2205_s6 + $0xf0] sm:$0xff] %vm941_vm2, %v702_v16  ;;  %1012 = vst.msk [vmem:[%s2205_s6 + $0x230] sm:$0xff] %vm941_vm2, %v902_v17 }
 0x11a   : > { %v1730_v18 = vpop.f32.mrf.mxu0  ;;  %v1790_v19 = vpop.f32.mrf.mxu1 }
 0x11b   : > { %975 = vst.msk [vmem:[%s2205_s6 + $0x108] sm:$0xff] %vm941_vm2, %v1730_v18  ;;  %1015 = vst.msk [vmem:[%s2205_s6 + $0x248] sm:$0xff] %vm941_vm2, %v1790_v19 }
 0x11c   : > { %v712_v20 = vpop.f32.mrf.mxu0  ;;  %v912_v21 = vpop.f32.mrf.mxu1 }
 0x11d   : > { %974 = vst.msk [vmem:[%s2205_s6 + $0x100] sm:$0xff] %vm941_vm2, %v712_v20  ;;  %1014 = vst.msk [vmem:[%s2205_s6 + $0x240] sm:$0xff] %vm941_vm2, %v912_v21 }
 0x11e   : > { %v1733_v22 = vpop.f32.mrf.mxu0  ;;  %v1793_v23 = vpop.f32.mrf.mxu1 }
 0x11f   : > { %977 = vst.msk [vmem:[%s2205_s6 + $0x118] sm:$0xff] %vm941_vm2, %v1733_v22  ;;  %1017 = vst.msk [vmem:[%s2205_s6 + $0x258] sm:$0xff] %vm941_vm2, %v1793_v23 }
 0x120   : > { %v722_v24 = vpop.f32.mrf.mxu0  ;;  %v922_v25 = vpop.f32.mrf.mxu1 }
 0x121   : > { %976 = vst.msk [vmem:[%s2205_s6 + $0x110] sm:$0xff] %vm941_vm2, %v722_v24  ;;  %1016 = vst.msk [vmem:[%s2205_s6 + $0x250] sm:$0xff] %vm941_vm2, %v922_v25 }
 0x122   : > { %v1736_v26 = vpop.f32.mrf.mxu0  ;;  %v1796_v27 = vpop.f32.mrf.mxu1 }
 0x123   : > { %979 = vst.msk [vmem:[%s2205_s6 + $0x128] sm:$0xff] %vm941_vm2, %v1736_v26  ;;  %1019 = vst.msk [vmem:[%s2205_s6 + $0x268] sm:$0xff] %vm941_vm2, %v1796_v27 }
 0x124   : > { %v732_v28 = vpop.f32.mrf.mxu0  ;;  %v932_v29 = vpop.f32.mrf.mxu1 }
 0x125   : > { %978 = vst.msk [vmem:[%s2205_s6 + $0x120] sm:$0xff] %vm941_vm2, %v732_v28  ;;  %1018 = vst.msk [vmem:[%s2205_s6 + $0x260] sm:$0xff] %vm941_vm2, %v932_v29  ;;  %1026 = sbr.rel (!%p2022_p4) target bundleno = 362 (0x16a), region = 32 }
 0x126   : > { %v1739_v30 = vpop.f32.mrf.mxu0 }
 0x127   : > { %981 = vst.msk [vmem:[%s2205_s6 + $0x138] sm:$0xff] %vm941_vm2, %v1739_v30 }
 0x128   : > { %v742_v31 = vpop.f32.mrf.mxu0 }
 0x129   : > { %980 = vst.msk [vmem:[%s2205_s6 + $0x130] sm:$0xff] %vm941_vm2, %v742_v31 }
 0x12a   : > { %s2582_s7 = smov (!%p1029_p8, %s1028_s7), 78 }
 0x12b   : > { %s1572_s15 = sshll.u32 %s2582_s7, 7 }
 0x12c   : > { %p1575_p9 = scmp.eq.s32.totalorder %s1572_s15, 0 }
 0x12d   : > { %s2376_s18 = sshrl.u32 (!%p1575_p9), %s2582_s7, 6 }
 0x12e   : > { %1037 = sbr.rel (%p1575_p9) target bundleno = 362 (0x16a), region = 36  ;;  %p1576_p10 = scmp.le.s32.totalorder (!%p1575_p9), %s2376_s18, 0 }
 0x133   : > { %1444 = sbr.rel (%p1576_p10) target bundleno = 345 (0x159), region = 112  ;;  %s2573_s12 = smov (!%p1576_p10), %s2370_s14 }
 0x134   : > { %s2574_s17 = smov (!%p1576_p10), %s2205_s6  ;;  %s2385_s19 = smov (!%p1576_p10), 0  }
 0x135   : > { %s2387_s20 = smov (!%p1576_p10), 0  }
 0x138 LB: >> { %v1226_v32 = vld [vmem:[%s1956_s17] sm:$0xff]  ;;  %v1228_v33 = vld [vmem:[%s1956_s17 + $0x8] sm:$0xff]  ;;  %v1230_v34 = vld [vmem:[%s1956_s17 + $0x10] sm:$0xff]  ;;  %s1354_s21 = sadd.s32 1, %s1960_s19  ;;  %s1220_s20 = sadd.s32 1, %s1964_s20   ;;  %s1964_s20 = sphi %s2387_s20, %s1220_s20   ;;  %s1960_s19 = sphi %s2385_s19, %s2577_s19   ;;  %s1956_s17 = sphi %s2574_s17, %s2576_s17   ;;  %s1952_s12 = sphi %s2573_s12, %s2575_s12  }
 0x139   : >> { %1227 = vst [vmem:[%s1952_s12] sm:$0xff] %v1226_v32  ;;  %1229 = vst [vmem:[%s1952_s12 + $0x8] sm:$0xff] %v1228_v33  ;;  %v1232_v35 = vld [vmem:[%s1956_s17 + $0x18] sm:$0xff]  ;;  %v1234_v36 = vld [vmem:[%s1956_s17 + $0x20] sm:$0xff]  ;;  %p1355_p11 = scmp.ge.s32.totalorder %s1354_s21, %s2376_s18  ;;  %p1219_p12 = scmp.ge.s32.totalorder %s1220_s20, %s2376_s18 }
 0x13a   : >> { %1231 = vst [vmem:[%s1952_s12 + $0x10] sm:$0xff] %v1230_v34  ;;  %v1236_v37 = vld [vmem:[%s1956_s17 + $0x28] sm:$0xff]  ;;  %1233 = vst [vmem:[%s1952_s12 + $0x18] sm:$0xff] %v1232_v35  ;;  %v1238_v38 = vld [vmem:[%s1956_s17 + $0x30] sm:$0xff] }
 0x13b   : >> { %1235 = vst [vmem:[%s1952_s12 + $0x20] sm:$0xff] %v1234_v36  ;;  %1237 = vst [vmem:[%s1952_s12 + $0x28] sm:$0xff] %v1236_v37  ;;  %v1240_v39 = vld [vmem:[%s1956_s17 + $0x38] sm:$0xff]  ;;  %v1242_v40 = vld [vmem:[%s1956_s17 + $0x40] sm:$0xff]  ;;  %s2584_s21 = smov (%p1355_p11, %s1354_s21), 0 }
 0x13c   : >> { %1239 = vst [vmem:[%s1952_s12 + $0x30] sm:$0xff] %v1238_v38  ;;  %1241 = vst [vmem:[%s1952_s12 + $0x38] sm:$0xff] %v1240_v39  ;;  %v1244_v41 = vld [vmem:[%s1956_s17 + $0x48] sm:$0xff]  ;;  %v1246_v42 = vld [vmem:[%s1956_s17 + $0x50] sm:$0xff]  ;;  %s1577_s22 = sshll.u32 %s2584_s21, 9  ;;  %s2577_s19 = smov %s2584_s21 }
 0x13d   : >> { %1243 = vst [vmem:[%s1952_s12 + $0x40] sm:$0xff] %v1242_v40  ;;  %v1248_v43 = vld [vmem:[%s1956_s17 + $0x58] sm:$0xff]  ;;  %1245 = vst [vmem:[%s1952_s12 + $0x48] sm:$0xff] %v1244_v41  ;;  %v1250_v44 = vld [vmem:[%s1956_s17 + $0x60] sm:$0xff]  ;;  %s2443_s23 = scalar_lea.vmem %s2205_s6, %s1577_s22 [#allocation2]   ;;  %s2446_s24 = scalar_lea.vmem %s2370_s14, %s1577_s22  }
 0x13e   : >> { %1247 = vst [vmem:[%s1952_s12 + $0x50] sm:$0xff] %v1246_v42  ;;  %1249 = vst [vmem:[%s1952_s12 + $0x58] sm:$0xff] %v1248_v43  ;;  %v1252_v45 = vld [vmem:[%s1956_s17 + $0x68] sm:$0xff]  ;;  %v1254_v46 = vld [vmem:[%s1956_s17 + $0x70] sm:$0xff] }
 0x13f   : >> { %1251 = vst [vmem:[%s1952_s12 + $0x60] sm:$0xff] %v1250_v44  ;;  %1253 = vst [vmem:[%s1952_s12 + $0x68] sm:$0xff] %v1252_v45  ;;  %v1256_v47 = vld [vmem:[%s1956_s17 + $0x78] sm:$0xff]  ;;  %v1258_v48 = vld [vmem:[%s1956_s17 + $0x80] sm:$0xff] }
 0x140   : >> { %1255 = vst [vmem:[%s1952_s12 + $0x70] sm:$0xff] %v1254_v46  ;;  %v1260_v49 = vld [vmem:[%s1956_s17 + $0x88] sm:$0xff]  ;;  %1257 = vst [vmem:[%s1952_s12 + $0x78] sm:$0xff] %v1256_v47  ;;  %v1262_v50 = vld [vmem:[%s1956_s17 + $0x90] sm:$0xff] }
 0x141   : >> { %1259 = vst [vmem:[%s1952_s12 + $0x80] sm:$0xff] %v1258_v48  ;;  %1261 = vst [vmem:[%s1952_s12 + $0x88] sm:$0xff] %v1260_v49  ;;  %v1264_v51 = vld [vmem:[%s1956_s17 + $0x98] sm:$0xff]  ;;  %v1266_v52 = vld [vmem:[%s1956_s17 + $0xa0] sm:$0xff] }
 0x142   : >> { %1263 = vst [vmem:[%s1952_s12 + $0x90] sm:$0xff] %v1262_v50  ;;  %1265 = vst [vmem:[%s1952_s12 + $0x98] sm:$0xff] %v1264_v51  ;;  %v1268_v53 = vld [vmem:[%s1956_s17 + $0xa8] sm:$0xff]  ;;  %v1270_v54 = vld [vmem:[%s1956_s17 + $0xb0] sm:$0xff] }
 0x143   : >> { %1267 = vst [vmem:[%s1952_s12 + $0xa0] sm:$0xff] %v1266_v52  ;;  %v1272_v55 = vld [vmem:[%s1956_s17 + $0xb8] sm:$0xff]  ;;  %1269 = vst [vmem:[%s1952_s12 + $0xa8] sm:$0xff] %v1268_v53  ;;  %v1274_v56 = vld [vmem:[%s1956_s17 + $0xc0] sm:$0xff] }
 0x144   : >> { %1271 = vst [vmem:[%s1952_s12 + $0xb0] sm:$0xff] %v1270_v54  ;;  %1273 = vst [vmem:[%s1952_s12 + $0xb8] sm:$0xff] %v1272_v55  ;;  %v1276_v57 = vld [vmem:[%s1956_s17 + $0xc8] sm:$0xff]  ;;  %v1278_v58 = vld [vmem:[%s1956_s17 + $0xd0] sm:$0xff] }
 0x145   : >> { %1275 = vst [vmem:[%s1952_s12 + $0xc0] sm:$0xff] %v1274_v56  ;;  %1277 = vst [vmem:[%s1952_s12 + $0xc8] sm:$0xff] %v1276_v57  ;;  %v1280_v59 = vld [vmem:[%s1956_s17 + $0xd8] sm:$0xff]  ;;  %v1282_v60 = vld [vmem:[%s1956_s17 + $0xe0] sm:$0xff] }
 0x146   : >> { %1279 = vst [vmem:[%s1952_s12 + $0xd0] sm:$0xff] %v1278_v58  ;;  %v1284_v61 = vld [vmem:[%s1956_s17 + $0xe8] sm:$0xff]  ;;  %1281 = vst [vmem:[%s1952_s12 + $0xd8] sm:$0xff] %v1280_v59  ;;  %v1286_v62 = vld [vmem:[%s1956_s17 + $0xf0] sm:$0xff] }
 0x147   : >> { %1283 = vst [vmem:[%s1952_s12 + $0xe0] sm:$0xff] %v1282_v60  ;;  %1285 = vst [vmem:[%s1952_s12 + $0xe8] sm:$0xff] %v1284_v61  ;;  %v1288_v63 = vld [vmem:[%s1956_s17 + $0xf8] sm:$0xff]  ;;  %v1290_v0 = vld [vmem:[%s1956_s17 + $0x100] sm:$0xff] }
 0x148   : >> { %1287 = vst [vmem:[%s1952_s12 + $0xf0] sm:$0xff] %v1286_v62  ;;  %1289 = vst [vmem:[%s1952_s12 + $0xf8] sm:$0xff] %v1288_v63  ;;  %v1292_v1 = vld [vmem:[%s1956_s17 + $0x108] sm:$0xff]  ;;  %v1294_v2 = vld [vmem:[%s1956_s17 + $0x110] sm:$0xff] }
 0x149   : >> { %1291 = vst [vmem:[%s1952_s12 + $0x100] sm:$0xff] %v1290_v0  ;;  %v1296_v3 = vld [vmem:[%s1956_s17 + $0x118] sm:$0xff]  ;;  %1293 = vst [vmem:[%s1952_s12 + $0x108] sm:$0xff] %v1292_v1  ;;  %v1298_v4 = vld [vmem:[%s1956_s17 + $0x120] sm:$0xff] }
 0x14a   : >> { %1295 = vst [vmem:[%s1952_s12 + $0x110] sm:$0xff] %v1294_v2  ;;  %1297 = vst [vmem:[%s1952_s12 + $0x118] sm:$0xff] %v1296_v3  ;;  %v1300_v5 = vld [vmem:[%s1956_s17 + $0x128] sm:$0xff]  ;;  %v1302_v6 = vld [vmem:[%s1956_s17 + $0x130] sm:$0xff] }
 0x14b   : >> { %1299 = vst [vmem:[%s1952_s12 + $0x120] sm:$0xff] %v1298_v4  ;;  %1301 = vst [vmem:[%s1952_s12 + $0x128] sm:$0xff] %v1300_v5  ;;  %v1304_v7 = vld [vmem:[%s1956_s17 + $0x138] sm:$0xff]  ;;  %v1306_v8 = vld [vmem:[%s1956_s17 + $0x140] sm:$0xff] }
 0x14c   : >> { %1303 = vst [vmem:[%s1952_s12 + $0x130] sm:$0xff] %v1302_v6  ;;  %v1308_v9 = vld [vmem:[%s1956_s17 + $0x148] sm:$0xff]  ;;  %1305 = vst [vmem:[%s1952_s12 + $0x138] sm:$0xff] %v1304_v7  ;;  %v1310_v10 = vld [vmem:[%s1956_s17 + $0x150] sm:$0xff] }
 0x14d   : >> { %1307 = vst [vmem:[%s1952_s12 + $0x140] sm:$0xff] %v1306_v8  ;;  %1309 = vst [vmem:[%s1952_s12 + $0x148] sm:$0xff] %v1308_v9  ;;  %v1312_v11 = vld [vmem:[%s1956_s17 + $0x158] sm:$0xff]  ;;  %v1314_v12 = vld [vmem:[%s1956_s17 + $0x160] sm:$0xff] }
 0x14e   : >> { %1311 = vst [vmem:[%s1952_s12 + $0x150] sm:$0xff] %v1310_v10  ;;  %1313 = vst [vmem:[%s1952_s12 + $0x158] sm:$0xff] %v1312_v11  ;;  %v1316_v13 = vld [vmem:[%s1956_s17 + $0x168] sm:$0xff]  ;;  %v1318_v14 = vld [vmem:[%s1956_s17 + $0x170] sm:$0xff] }
 0x14f   : >> { %1315 = vst [vmem:[%s1952_s12 + $0x160] sm:$0xff] %v1314_v12  ;;  %v1320_v15 = vld [vmem:[%s1956_s17 + $0x178] sm:$0xff]  ;;  %1317 = vst [vmem:[%s1952_s12 + $0x168] sm:$0xff] %v1316_v13  ;;  %v1322_v16 = vld [vmem:[%s1956_s17 + $0x180] sm:$0xff] }
 0x150   : >> { %1319 = vst [vmem:[%s1952_s12 + $0x170] sm:$0xff] %v1318_v14  ;;  %1321 = vst [vmem:[%s1952_s12 + $0x178] sm:$0xff] %v1320_v15  ;;  %v1324_v17 = vld [vmem:[%s1956_s17 + $0x188] sm:$0xff]  ;;  %v1326_v18 = vld [vmem:[%s1956_s17 + $0x190] sm:$0xff] }
 0x151   : >> { %1323 = vst [vmem:[%s1952_s12 + $0x180] sm:$0xff] %v1322_v16  ;;  %1325 = vst [vmem:[%s1952_s12 + $0x188] sm:$0xff] %v1324_v17  ;;  %v1328_v19 = vld [vmem:[%s1956_s17 + $0x198] sm:$0xff]  ;;  %v1330_v20 = vld [vmem:[%s1956_s17 + $0x1a0] sm:$0xff] }
 0x152   : >> { %1327 = vst [vmem:[%s1952_s12 + $0x190] sm:$0xff] %v1326_v18  ;;  %v1332_v21 = vld [vmem:[%s1956_s17 + $0x1a8] sm:$0xff]  ;;  %1329 = vst [vmem:[%s1952_s12 + $0x198] sm:$0xff] %v1328_v19  ;;  %v1334_v22 = vld [vmem:[%s1956_s17 + $0x1b0] sm:$0xff] }
 0x153   : >> { %1331 = vst [vmem:[%s1952_s12 + $0x1a0] sm:$0xff] %v1330_v20  ;;  %1333 = vst [vmem:[%s1952_s12 + $0x1a8] sm:$0xff] %v1332_v21  ;;  %v1336_v23 = vld [vmem:[%s1956_s17 + $0x1b8] sm:$0xff]  ;;  %v1338_v24 = vld [vmem:[%s1956_s17 + $0x1c0] sm:$0xff] }
 0x154   : >> { %1335 = vst [vmem:[%s1952_s12 + $0x1b0] sm:$0xff] %v1334_v22  ;;  %1337 = vst [vmem:[%s1952_s12 + $0x1b8] sm:$0xff] %v1336_v23  ;;  %v1340_v25 = vld [vmem:[%s1956_s17 + $0x1c8] sm:$0xff]  ;;  %v1342_v26 = vld [vmem:[%s1956_s17 + $0x1d0] sm:$0xff]  ;;  %1222 = sbr.rel (!%p1219_p12) target bundleno = 312 (0x138), region = 118 }
 0x155   : >> { %1339 = vst [vmem:[%s1952_s12 + $0x1c0] sm:$0xff] %v1338_v24  ;;  %v1344_v27 = vld [vmem:[%s1956_s17 + $0x1d8] sm:$0xff]  ;;  %1341 = vst [vmem:[%s1952_s12 + $0x1c8] sm:$0xff] %v1340_v25  ;;  %v1346_v28 = vld [vmem:[%s1956_s17 + $0x1e0] sm:$0xff] }
 0x156   : >> { %1343 = vst [vmem:[%s1952_s12 + $0x1d0] sm:$0xff] %v1342_v26  ;;  %1345 = vst [vmem:[%s1952_s12 + $0x1d8] sm:$0xff] %v1344_v27  ;;  %v1348_v29 = vld [vmem:[%s1956_s17 + $0x1e8] sm:$0xff]  ;;  %v1350_v30 = vld [vmem:[%s1956_s17 + $0x1f0] sm:$0xff] }
 0x157   : >> { %1347 = vst [vmem:[%s1952_s12 + $0x1e0] sm:$0xff] %v1346_v28  ;;  %1349 = vst [vmem:[%s1952_s12 + $0x1e8] sm:$0xff] %v1348_v29  ;;  %v1352_v31 = vld [vmem:[%s1956_s17 + $0x1f8] sm:$0xff]  ;;  %s2576_s17 = smov %s2443_s23 }
 0x158   : >> { %1351 = vst [vmem:[%s1952_s12 + $0x1f0] sm:$0xff] %v1350_v30  ;;  %1353 = vst [vmem:[%s1952_s12 + $0x1f8] sm:$0xff] %v1352_v31  ;;  %s2575_s12 = smov %s2446_s24 }
 0x159 PF: > { %s2551_s25 = sand.u32 63, %s2582_s7   ;;  %s1588_s26 = sshll.u32 %s2376_s18, 9 }
 0x15a   : > { %s1365_s27 = scalar_lea.vmem %s2205_s6, %s1588_s26 [#allocation2]   ;;  %s1367_s28 = scalar_lea.vmem %s2370_s14, %s1588_s26  }
 0x15b   : > { %p1582_p13 = scmp.le.s32.totalorder %s2551_s25, 0 }
 0x15c   : > { %s1966_s29 = smov (!%p1582_p13), %s1367_s28   ;;  %s1970_s30 = smov (!%p1582_p13), %s1365_s27  }
 0x15d   : > { %1458 = sbr.rel (%p1582_p13) target bundleno = 362 (0x16a), region = 123  ;;  %s1974_s3 = smov (!%p1582_p13), 0  }
 0x15e   : > { %s1978_s4 = smov (!%p1582_p13), 0  }
 0x162 LB: >> { %v1377_v32 = vld [vmem:[%s1972_s30] sm:$0xff]  ;;  %s1379_s5 = sadd.s32 1, %s1976_s3  ;;  %s1371_s4 = sadd.s32 1, %s1980_s4   ;;  %s1980_s4 = sphi %s1978_s4, %s1371_s4   ;;  %s1976_s3 = sphi %s1974_s3, %s1975_s3   ;;  %s1972_s30 = sphi %s1970_s30, %s1384_s30   ;;  %s1968_s29 = sphi %s1966_s29, %s1385_s29  }
 0x163   : >> { %1378 = vst [vmem:[%s1968_s29] sm:$0xff] %v1377_v32  ;;  %p1380_p0 = scmp.ge.s32.totalorder %s1379_s5, %s2551_s25  ;;  %p1370_p1 = scmp.ge.s32.totalorder %s1371_s4, %s2551_s25 }
 0x165   : >> { %s2586_s5 = smov (%p1380_p0, %s1379_s5), 0  ;;  %1373 = sbr.rel (!%p1370_p1) target bundleno = 354 (0x162), region = 129 }
 0x166   : >> { %s1583_s6 = sshll.u32 %s2586_s5, 3  ;;  %s1975_s3 = smov %s2586_s5  }
 0x167   : >> { %s1384_s30 = scalar_lea.vmem %s1365_s27, %s1583_s6 [#allocation2]   ;;  %s1385_s29 = scalar_lea.vmem %s1367_s28, %s1583_s6  }
 0x16a PF: > { %p9_p2 = scmp.ge.s32.totalorder %s2012_s13, 4   ;;  %s2578_s9 = smov %s1944_s10 }
 0x16b   : > { %s2579_s10 = smov %s2020_s16  ;;  %s2580_s11 = smov %s2012_s13 }
 0x16c   :  { %11 = sbr.rel (!%p9_p2) target bundleno = 2 (0x2), region = 140 }

</bundles_post_ra>
